<compile_context>
chip_gen: v5e
topology: v5e:2x2
jax: 0.10.0
libtpu: 0.0.40
codegen_flags: <defaults>
</compile_context>

<pallas_src>
import functools

import jax
import jax.numpy as jnp
from jax.experimental import pallas as pl
from jax.experimental.pallas import tpu as pltpu


def _fused_textcnn_kernel(x_ref, w_ref, b_ref, o_ref, *,
                          seq_len, filter_sizes, n_feat_maps):
    """One batch tile, all filter sizes.

    x_ref: [Bt*S, E]        (VMEM, compute dtype)
    w_ref: [E, sum(fs)*NF]  (VMEM, compute dtype, grid-invariant)
    b_ref: [1, NF_total]    (VMEM, f32, grid-invariant)
    o_ref: [Bt, NF_total]   (VMEM, f32)
    """
    bt = o_ref.shape[0]
    # One big MXU matmul: M = Bt*S, N = sum(fs)*NF, f32 accumulation.
    y = jnp.dot(x_ref[...], w_ref[...], preferred_element_type=jnp.float32)
    k_total = y.shape[-1]
    y = y.reshape(bt, seq_len, k_total)            # [Bt, S, sum(fs)*NF]

    outs = []
    col = 0
    for i, fs in enumerate(filter_sizes):          # fs list is static -> unrolled
        t_out = seq_len - fs + 1
        # Tap 0 initializes the accumulator (no zeros broadcast).
        acc = y[:, 0:t_out, col:col + n_feat_maps]
        for k in range(1, fs):
            acc = acc + y[:, k:k + t_out,
                          col + k * n_feat_maps: col + (k + 1) * n_feat_maps]
        col += fs * n_feat_maps
        pooled = jnp.max(acc, axis=1)                              # [Bt, NF] (XLU)
        bias = b_ref[:, i * n_feat_maps:(i + 1) * n_feat_maps]     # [1, NF]
        # bias + ReLU AFTER the max (identical math, far less VPU traffic).
        outs.append(jnp.maximum(pooled + bias, 0.0))
    o_ref[...] = jnp.concatenate(outs, axis=1).astype(o_ref.dtype)


def basic_text_cnn_forward(x, params, *, block_b=8, compute_dtype=jnp.float32):
    """x: [B, S, E] f32; params: list of (w [fs, E, NF], b [1, NF]) -> [B, NF*len(params)]."""
    B, S, E = x.shape
    filter_sizes = tuple(int(w.shape[0]) for (w, _) in params)
    NF = int(params[0][0].shape[-1])
    assert S >= max(filter_sizes), "seq_len must be >= max(filter_sizes)"

    # Pack all taps of all filter sizes into one weight matrix [E, sum(fs)*NF]
    # (tap k of filter i lives in columns [off_i + k*NF : off_i + (k+1)*NF])
    # and all biases into [1, NF_total].
    w_cols, b_cols = [], []
    for (w, b) in params:
        fs = int(w.shape[0])
        w_cols.append(jnp.transpose(w, (1, 0, 2)).reshape(E, fs * NF))
        b_cols.append(jnp.reshape(b, (1, NF)))
    w_cat = jnp.concatenate(w_cols, axis=1).astype(compute_dtype)   # [E, K_total]
    b_cat = jnp.concatenate(b_cols, axis=1).astype(jnp.float32)     # [1, NF_total]
    k_total = int(w_cat.shape[1])
    nf_total = NF * len(filter_sizes)

    # Batch tile: multiple of 8 sublanes; pad B up to a multiple of it.
    # For production shapes size bt so 2 double-buffered (bt*S, E) input blocks
    # + W_cat + output fit the per-TC VMEM budget (64 MiB on v7x, 128 MiB v5e/v6e).
    bt = max(8, (int(block_b) // 8) * 8)
    b_pad = ((B + bt - 1) // bt) * bt
    if b_pad != B:
        x = jnp.concatenate([x, jnp.zeros((b_pad - B, S, E), x.dtype)], axis=0)
    # Flatten batch*time so the MXU M-dim is bt*S.
    x_flat = x.reshape(b_pad * S, E).astype(compute_dtype)

    kernel = functools.partial(_fused_textcnn_kernel, seq_len=S,
                               filter_sizes=filter_sizes, n_feat_maps=NF)
    out = pl.pallas_call(
        kernel,
        out_shape=jax.ShapeDtypeStruct((b_pad, nf_total), jnp.float32),
        grid_spec=pltpu.PrefetchScalarGridSpec(
            num_scalar_prefetch=0,
            grid=(b_pad // bt,),
            in_specs=[
                pl.BlockSpec((bt * S, E), lambda i: (i, 0)),
                # Constant index_maps: the pipeline fetches these once and skips
                # re-DMA on later grid steps (grid-invariant blocks).
                pl.BlockSpec((E, k_total), lambda i: (0, 0)),
                pl.BlockSpec((1, nf_total), lambda i: (0, 0)),
            ],
            out_specs=pl.BlockSpec((bt, nf_total), lambda i: (i, 0)),
        ),
        compiler_params=pltpu.CompilerParams(
            # Batch-tile axis is independent -> megacore sharding on v7x.
            dimension_semantics=("parallel",)),
    )(x_flat, w_cat, b_cat)
    # Dropout is identity in eval mode (inference); nothing to do.
    return out[:B]


def _reference_forward(x, params):
    """Pure-JAX reference (same math as the PyTorch module, no Pallas)."""
    outs = []
    for w, b in params:
        fs, E, NF = w.shape
        B, S, _ = x.shape
        t_out = S - fs + 1
        acc = jnp.zeros((B, t_out, NF), jnp.float32)
        for k in range(fs):
            acc += jnp.einsum("bte,ef->btf", x[:, k:k + t_out, :], w[k])
        acc = jnp.maximum(acc + b[None, :, :], 0.0)   # bias then ReLU (PyTorch order)
        outs.append(jnp.max(acc, axis=1))
    return jnp.concatenate(outs, axis=1)


if __name__ == "__main__":
    # Small, module-consistent shapes; batch not a multiple of the tile to
    # exercise the padding path.
    batch, seq_len, emb_size = 6, 16, 32
    filter_sizes = [3, 4, 5]
    n_feat_maps = 8
    dropout_prob = 0.5  # identity at inference

    key = jax.random.PRNGKey(0)
    key, kx = jax.random.split(key)
    x = jax.random.normal(kx, (batch, seq_len, emb_size), dtype=jnp.float32)

    # Deterministic parameter init (Conv2d(1, nf, (fs, emb)) equivalent):
    # PyTorch weight [nf, 1, fs, emb] stored here as [fs, emb, nf]; bias [1, nf].
    params = []
    for fs in filter_sizes:
        key, kw, kb = jax.random.split(key, 3)
        fan_in = 1 * fs * emb_size
        bound = 1.0 / float(fan_in) ** 0.5
        w = jax.random.uniform(kw, (fs, emb_size, n_feat_maps),
                               minval=-bound, maxval=bound, dtype=jnp.float32)
        b = jax.random.uniform(kb, (1, n_feat_maps),
                               minval=-bound, maxval=bound, dtype=jnp.float32)
        params.append((w, b))

    ref = _reference_forward(x, params)

    # f32 path (v5e-friendly; also the tight-tolerance correctness check).
    out = basic_text_cnn_forward(x, params, block_b=8, compute_dtype=jnp.float32)
    out = jax.block_until_ready(out)
    assert out.shape == (batch, n_feat_maps * len(filter_sizes)), out.shape
    assert jnp.allclose(out, ref, atol=1e-5, rtol=1e-5), \
        f"max err {jnp.max(jnp.abs(out - ref))}"

    # bf16 MXU-operand path (v6e/v7x recommendation): f32 accumulation/epilogue.
    out_bf16 = basic_text_cnn_forward(x, params, block_b=8,
                                      compute_dtype=jnp.bfloat16)
    out_bf16 = jax.block_until_ready(out_bf16)
    assert out_bf16.shape == ref.shape
    assert jnp.allclose(out_bf16, ref, atol=5e-2, rtol=5e-2), \
        f"max err {jnp.max(jnp.abs(out_bf16 - ref))}"

    print("KERNEL_OK")
</pallas_src>

<mosaic_0001>
module attributes {stable_mosaic.version = 11 : i64} {
  func.func @_fused_textcnn_kernel(%arg0: i32, %arg1: memref<128x32xf32, #tpu.memory_space<vmem>>, %arg2: memref<32x96xf32, #tpu.memory_space<vmem>>, %arg3: memref<1x24xf32, #tpu.memory_space<vmem>>, %arg4: memref<8x24xf32, #tpu.memory_space<vmem>>) attributes {dimension_semantics = [#tpu.dimension_semantics<parallel>], iteration_bounds = array<i64: 1>, scalar_prefetch = 0 : i64, scratch_operands = 0 : i64, tpu.core_type = #tpu.core_type<tc>, window_params = [{transform_indices = @transform_0, window_bounds = array<i64: 128, 32>}, {pipeline_mode = #tpu.pipeline_mode<synchronous>, transform_indices = @transform_1, window_bounds = array<i64: 32, 96>}, {pipeline_mode = #tpu.pipeline_mode<synchronous>, transform_indices = @transform_2, window_bounds = array<i64: 1, 24>}, {transform_indices = @transform_3, window_bounds = array<i64: 8, 24>}]} {
    %c0 = arith.constant 0 : index
    %c0_0 = arith.constant 0 : index
    %0 = vector.load %arg1[%c0, %c0_0] : memref<128x32xf32, #tpu.memory_space<vmem>>, vector<128x32xf32>
    %c0_1 = arith.constant 0 : index
    %c0_2 = arith.constant 0 : index
    %1 = vector.load %arg2[%c0_1, %c0_2] : memref<32x96xf32, #tpu.memory_space<vmem>>, vector<32x96xf32>
    %cst = arith.constant dense<0.000000e+00> : vector<128x96xf32>
    %2 = tpu.matmul %0, %1, %cst {dimension_numbers = #tpu.dot_dimension_numbers<[1], [0], [0], [1], [0, 0, 1, 1], [], []>} : vector<128x32xf32>, vector<32x96xf32>, vector<128x96xf32> -> vector<128x96xf32>
    %3 = vector.shape_cast %2 : vector<128x96xf32> to vector<8x16x96xf32>
    %4 = vector.extract_strided_slice %3 {offsets = [0, 0, 0], sizes = [8, 14, 8], strides = [1, 1, 1]} : vector<8x16x96xf32> to vector<8x14x8xf32>
    %5 = vector.extract_strided_slice %3 {offsets = [0, 1, 8], sizes = [8, 14, 8], strides = [1, 1, 1]} : vector<8x16x96xf32> to vector<8x14x8xf32>
    %6 = arith.addf %4, %5 : vector<8x14x8xf32>
    %7 = vector.extract_strided_slice %3 {offsets = [0, 2, 16], sizes = [8, 14, 8], strides = [1, 1, 1]} : vector<8x16x96xf32> to vector<8x14x8xf32>
    %8 = arith.addf %6, %7 : vector<8x14x8xf32>
    %cst_3 = arith.constant dense<0xFF800000> : vector<8x8xf32>
    %9 = vector.multi_reduction <maximumf>, %8, %cst_3 [1] : vector<8x14x8xf32> to vector<8x8xf32>
    %c0_4 = arith.constant 0 : index
    %c0_5 = arith.constant 0 : index
    %10 = vector.load %arg3[%c0_4, %c0_5] : memref<1x24xf32, #tpu.memory_space<vmem>>, vector<1x8xf32>
    %11 = vector.broadcast %10 : vector<1x8xf32> to vector<8x8xf32>
    %12 = arith.addf %9, %11 : vector<8x8xf32>
    %cst_6 = arith.constant 0.000000e+00 : f32
    %13 = vector.broadcast %cst_6 : f32 to vector<8x8xf32>
    %14 = arith.maximumf %12, %13 : vector<8x8xf32>
    %15 = vector.extract_strided_slice %3 {offsets = [0, 0, 24], sizes = [8, 13, 8], strides = [1, 1, 1]} : vector<8x16x96xf32> to vector<8x13x8xf32>
    %16 = vector.extract_strided_slice %3 {offsets = [0, 1, 32], sizes = [8, 13, 8], strides = [1, 1, 1]} : vector<8x16x96xf32> to vector<8x13x8xf32>
    %17 = arith.addf %15, %16 : vector<8x13x8xf32>
    %18 = vector.extract_strided_slice %3 {offsets = [0, 2, 40], sizes = [8, 13, 8], strides = [1, 1, 1]} : vector<8x16x96xf32> to vector<8x13x8xf32>
    %19 = arith.addf %17, %18 : vector<8x13x8xf32>
    %20 = vector.extract_strided_slice %3 {offsets = [0, 3, 48], sizes = [8, 13, 8], strides = [1, 1, 1]} : vector<8x16x96xf32> to vector<8x13x8xf32>
    %21 = arith.addf %19, %20 : vector<8x13x8xf32>
    %cst_7 = arith.constant dense<0xFF800000> : vector<8x8xf32>
    %22 = vector.multi_reduction <maximumf>, %21, %cst_7 [1] : vector<8x13x8xf32> to vector<8x8xf32>
    %c0_8 = arith.constant 0 : index
    %c8 = arith.constant 8 : index
    %23 = vector.load %arg3[%c0_8, %c8] : memref<1x24xf32, #tpu.memory_space<vmem>>, vector<1x8xf32>
    %24 = vector.broadcast %23 : vector<1x8xf32> to vector<8x8xf32>
    %25 = arith.addf %22, %24 : vector<8x8xf32>
    %cst_9 = arith.constant 0.000000e+00 : f32
    %26 = vector.broadcast %cst_9 : f32 to vector<8x8xf32>
    %27 = arith.maximumf %25, %26 : vector<8x8xf32>
    %28 = vector.extract_strided_slice %3 {offsets = [0, 0, 56], sizes = [8, 12, 8], strides = [1, 1, 1]} : vector<8x16x96xf32> to vector<8x12x8xf32>
    %29 = vector.extract_strided_slice %3 {offsets = [0, 1, 64], sizes = [8, 12, 8], strides = [1, 1, 1]} : vector<8x16x96xf32> to vector<8x12x8xf32>
    %30 = arith.addf %28, %29 : vector<8x12x8xf32>
    %31 = vector.extract_strided_slice %3 {offsets = [0, 2, 72], sizes = [8, 12, 8], strides = [1, 1, 1]} : vector<8x16x96xf32> to vector<8x12x8xf32>
    %32 = arith.addf %30, %31 : vector<8x12x8xf32>
    %33 = vector.extract_strided_slice %3 {offsets = [0, 3, 80], sizes = [8, 12, 8], strides = [1, 1, 1]} : vector<8x16x96xf32> to vector<8x12x8xf32>
    %34 = arith.addf %32, %33 : vector<8x12x8xf32>
    %35 = vector.extract_strided_slice %3 {offsets = [0, 4, 88], sizes = [8, 12, 8], strides = [1, 1, 1]} : vector<8x16x96xf32> to vector<8x12x8xf32>
    %36 = arith.addf %34, %35 : vector<8x12x8xf32>
    %cst_10 = arith.constant dense<0xFF800000> : vector<8x8xf32>
    %37 = vector.multi_reduction <maximumf>, %36, %cst_10 [1] : vector<8x12x8xf32> to vector<8x8xf32>
    %c0_11 = arith.constant 0 : index
    %c16 = arith.constant 16 : index
    %38 = vector.load %arg3[%c0_11, %c16] : memref<1x24xf32, #tpu.memory_space<vmem>>, vector<1x8xf32>
    %39 = vector.broadcast %38 : vector<1x8xf32> to vector<8x8xf32>
    %40 = arith.addf %37, %39 : vector<8x8xf32>
    %cst_12 = arith.constant 0.000000e+00 : f32
    %41 = vector.broadcast %cst_12 : f32 to vector<8x8xf32>
    %42 = arith.maximumf %40, %41 : vector<8x8xf32>
    %43 = tpu.concatenate %14, %27, %42 in 1 : vector<8x8xf32>, vector<8x8xf32>, vector<8x8xf32> -> vector<8x24xf32>
    %c0_13 = arith.constant 0 : index
    %c0_14 = arith.constant 0 : index
    %44 = vector.load %arg4[%c0_13, %c0_14] : memref<8x24xf32, #tpu.memory_space<vmem>>, vector<8x24xf32>
    tpu.vector_store %arg4[%c0_13, %c0_14], %43 {strides = array<i32>} : memref<8x24xf32, #tpu.memory_space<vmem>>, vector<8x24xf32>,
    return
  }
  func.func @transform_0(%arg0: i32) -> (i32, i32) {
    %c0_i32 = arith.constant 0 : i32
    %c0_i32_0 = arith.constant 0 : i32
    return %arg0, %c0_i32 : i32, i32
  }
  func.func @transform_1(%arg0: i32) -> (i32, i32) {
    %c0_i32 = arith.constant 0 : i32
    %c0_i32_0 = arith.constant 0 : i32
    %c0_i32_1 = arith.constant 0 : i32
    return %c0_i32, %c0_i32_0 : i32, i32
  }
  func.func @transform_2(%arg0: i32) -> (i32, i32) {
    %c0_i32 = arith.constant 0 : i32
    %c0_i32_0 = arith.constant 0 : i32
    %c0_i32_1 = arith.constant 0 : i32
    return %c0_i32, %c0_i32_0 : i32, i32
  }
  func.func @transform_3(%arg0: i32) -> (i32, i32) {
    %c0_i32 = arith.constant 0 : i32
    %c0_i32_0 = arith.constant 0 : i32
    return %arg0, %c0_i32 : i32, i32
  }
}

</mosaic_0001>

<bundles_post_ra>
// kernel: tpu_custom_call.1
= control target key start
LH: loop header
LB: loop body
LE: loop exit
PB: predicated region body
PF: predicated region fallthrough
CT: control target
= control target key end

     0   :  { %vm35_vm0 = vcmask 261120   ;;  %s1513_s0 = inlined_call_operand.vmem [shape: f32[128,32], index: 0, kind: input, shape index: {}]   ;;  %s1514_s1 = inlined_call_operand.vmem [shape: f32[32,96], index: 1, kind: input, shape index: {}]   ;;  %s1515_s2 = inlined_call_operand.vmem [shape: f32[1,24], index: 2, kind: input, shape index: {}]   ;;  %s1516_s3 = inlined_call_operand.hbm [shape: f32[8,24], index: 3, kind: output, shape index: {}]  }
   0x1   :  { %v34_v0 = vld [vmem:[%s1514_s1 + $0x18] sm:$0xff]  ;;  %v33_v1 = vld [vmem:[%s1514_s1 + $0x10] sm:$0xff]  ;;  %v32_v2 = vld [vmem:[%s1514_s1 + $0x8] sm:$0xff] }
   0x2   :  { %96 = vmatpush.msra.mxu0 %v34_v0  ;;  %918 = vmatpush.msra.mxu1 %v34_v0  ;;  %v31_v3 = vld [vmem:[%s1514_s1] sm:$0xff] }
   0x3   :  { %920 = vmatpush.msra.mxu3 %v34_v0  ;;  %919 = vmatpush.msra.mxu2 %v34_v0  ;;  %v15_v4 = vld [vmem:[%s1513_s0] sm:$0xff] }
   0x4   :  { %97 = vmatpush.msra.mxu0 %v33_v1  ;;  %921 = vmatpush.msra.mxu1 %v33_v1  ;;  %v19_v5 = vld [vmem:[%s1513_s0 + $0x20] sm:$0xff] }
   0x5   :  { %923 = vmatpush.msra.mxu3 %v33_v1  ;;  %922 = vmatpush.msra.mxu2 %v33_v1  ;;  %v27_v6 = vld [vmem:[%s1513_s0 + $0x60] sm:$0xff] }
   0x6   :  { %98 = vmatpush.msra.mxu0 %v32_v2  ;;  %924 = vmatpush.msra.mxu1 %v32_v2  ;;  %v23_v7 = vld [vmem:[%s1513_s0 + $0x40] sm:$0xff] }
   0x7   :  { %926 = vmatpush.msra.mxu3 %v32_v2  ;;  %925 = vmatpush.msra.mxu2 %v32_v2 }
   0x8   :  { %99 = vmatpush.msra.mxu0 %v31_v3  ;;  %927 = vmatpush.msra.mxu1 %v31_v3 }
   0x9   :  { %8 = vsyncpa [#allocation3], 0  ;;  %902 = vmatmul.msk.f32.vlgmr.msra.gmra.mxu0 %vm35_vm0, %v15_v4  ;;  %906 = vmatmul.msk.f32.vlgmr.msra.gmra.mxu1 %vm35_vm0, %v19_v5  ;;  %v16_v8 = vld [vmem:[%s1513_s0 + $0x8] sm:$0xff]  ;;  %v17_v12 = vld [vmem:[%s1513_s0 + $0x10] sm:$0xff]  ;;  %s966_s24 = smov 120   ;;  %s967_s25 = smov 96  }
   0xa   :  { %929 = vmatpush.msra.mxu3 %v31_v3  ;;  %928 = vmatpush.msra.mxu2 %v31_v3  ;;  %v20_v9 = vld [vmem:[%s1513_s0 + $0x28] sm:$0xff]  ;;  %v21_v13 = vld [vmem:[%s1513_s0 + $0x30] sm:$0xff]  ;;  %v18_v16 = vld [vmem:[%s1513_s0 + $0x18] sm:$0xff]  ;;  %s968_s1 = smov 112   ;;  %vm254_vm1 = vcmask 1045504   ;;  %vm165_vm2 = vcmask 1046528  }
   0xb   :  { %914 = vmatmul.msk.f32.vlgmr.msra.gmra.mxu3 %vm35_vm0, %v27_v6  ;;  %910 = vmatmul.msk.f32.vlgmr.msra.gmra.mxu2 %vm35_vm0, %v23_v7  ;;  %v28_v10 = vld [vmem:[%s1513_s0 + $0x68] sm:$0xff]  ;;  %v25_v14 = vld [vmem:[%s1513_s0 + $0x50] sm:$0xff]  ;;  %v22_v17 = vld [vmem:[%s1513_s0 + $0x38] sm:$0xff]  ;;  %vm619_vm3 = vcmask 1043456   ;;  %vm437_vm4 = vcmask 1044480   ;;  %vm343_vm5 = vcmask 64512  }
   0xc   :  { %v24_v11 = vld [vmem:[%s1513_s0 + $0x48] sm:$0xff]  ;;  %v29_v15 = vld [vmem:[%s1513_s0 + $0x70] sm:$0xff]  ;;  %v26_v18 = vld [vmem:[%s1513_s0 + $0x58] sm:$0xff]  ;;  %vm345_vm6 = vcmask 62464   ;;  %vm526_vm7 = vcmask 261312   ;;  %vm528_vm8 = vcmask 258240  }
   0xd   :  { %v30_v19 = vld [vmem:[%s1513_s0 + $0x78] sm:$0xff]  ;;  %s965_s0 = smov 104   ;;  %vm708_vm9 = vcmask 523712   ;;  %vm710_vm10 = vcmask 519616   ;;  %s969_s28 = smov 40   ;;  %vm810_vm11 = vcmask 1041409  }
   0xe   :  { %s970_s29 = smov 16   ;;  %vm813_vm12 = vcmask 1042434   ;;  %vm816_vm13 = vcmask 1043459   ;;  %vm819_vm14 = vcmask 1044484   ;;  %vm822_vm15 = vcmask 1045509   ;;  %s972_s30 = smov [#allocation2]  }
   0xf   :  { %s891_s4 = sshll.u32 %s972_s30, 4  ;;  %s893_s7 = sshll.u32 %s1516_s3, 4  ;;  %s892_s4 = int_to_ptr.vmem [resolvable:$true] %s891_s4  ;;  %s894_s7 = int_to_ptr.hbm [resolvable:$true] %s893_s7 }
  0x11   :  { %903 = vmatmul.msk.f32.gmra.mxu0 %vm35_vm0, %v16_v8  ;;  %907 = vmatmul.msk.f32.gmra.mxu1 %vm35_vm0, %v20_v9 }
  0x13   :  { %915 = vmatmul.msk.f32.gmra.mxu3 %vm35_vm0, %v28_v10  ;;  %911 = vmatmul.msk.f32.gmra.mxu2 %vm35_vm0, %v24_v11 }
  0x19   :  { %904 = vmatmul.msk.f32.gmra.mxu0 %vm35_vm0, %v17_v12  ;;  %908 = vmatmul.msk.f32.gmra.mxu1 %vm35_vm0, %v21_v13 }
  0x1b   :  { %912 = vmatmul.msk.f32.gmra.mxu2 %vm35_vm0, %v25_v14  ;;  %916 = vmatmul.msk.f32.gmra.mxu3 %vm35_vm0, %v29_v15 }
  0x21   :  { %905 = vmatmul.msk.f32.gmra.mxu0 %vm35_vm0, %v18_v16  ;;  %909 = vmatmul.msk.f32.gmra.mxu1 %vm35_vm0, %v22_v17 }
  0x23   :  { %913 = vmatmul.msk.f32.gmra.mxu2 %vm35_vm0, %v26_v18  ;;  %917 = vmatmul.msk.f32.gmra.mxu3 %vm35_vm0, %v30_v19  ;;  %vm825_vm0 = vcmask 1046534  }
  0x86   :  { %v1069_v20 = vpop.f32.mrf.mxu0  ;;  %v1071_v21 = vpop.f32.mrf.mxu1 }
  0x87   :  { %v255_v30 = vrot.slane %v1069_v20, 2  ;;  %v172_v35 = vrot.slane %v1071_v21, 1  ;;  %v626_v36 = vrot.slane %v1071_v21, 4  ;;  %v166_v37 = vrot.slane %v1069_v20, 1 }
  0x88   :  { %v261_v43 = vrot.slane %v1071_v21, 2  ;;  %v444_v45 = vrot.slane %v1071_v21, 3  ;;  %v438_v50 = vrot.slane %v1069_v20, 3  ;;  %v620_v51 = vrot.slane %v1069_v20, 4 }
  0x8e   :  { %v1073_v22 = vpop.f32.mrf.mxu0  ;;  %v1075_v23 = vpop.f32.mrf.mxu1 }
  0x8f   :  { %v445_v24 = vrot.slane %v1075_v23, 3  ;;  %v173_v25 = vrot.slane %v1075_v23, 1  ;;  %v167_v26 = vrot.slane %v1073_v22, 1  ;;  %v621_v27 = vrot.slane %v1073_v22, 4  ;;  %v1093_v34 = vpop.f32.mrf.mxu3  ;;  %v1103_v40 = vpop.f32.mrf.mxu2 }
  0x90   :  { %v256_v28 = vrot.slane %v1073_v22, 2  ;;  %v262_v29 = vrot.slane %v1075_v23, 2  ;;  %v627_v31 = vrot.slane %v1075_v23, 4  ;;  %v439_v33 = vrot.slane %v1073_v22, 3 }
  0x91   :  { %472 = vrot.lane.b32.xlu1 %v445_v24, %s965_s0  ;;  %200 = vrot.lane.b32.xlu2 %v173_v25, %s966_s24  ;;  %v174_v38 = vsel %vm165_vm2, %v172_v35, %v173_v25  ;;  %v168_v41 = vsel %vm165_vm2, %v166_v37, %v167_v26  ;;  %v446_v47 = vsel %vm437_vm4, %v444_v45, %v445_v24  ;;  %v273_v57 = vrot.slane %v1093_v34, 2 }
  0x92   :  { %192 = vrot.lane.b32.xlu0 %v167_v26, %s966_s24  ;;  %v257_v32 = vsel %vm254_vm1, %v255_v30, %v256_v28  ;;  %v628_v39 = vsel %vm619_vm3, %v626_v36, %v627_v31  ;;  %v263_v46 = vsel %vm254_vm1, %v261_v43, %v262_v29  ;;  %v440_v52 = vsel %vm437_vm4, %v438_v50, %v439_v33 }
  0x93   :  { %v622_v53 = vsel %vm619_vm3, %v620_v51, %v621_v27  ;;  %v178_v62 = vrot.slane %v1103_v40, 1  ;;  %v456_v63 = vrot.slane %v1093_v34, 3  ;;  %v184_v0 = vrot.slane %v1093_v34, 1 }
  0x94   :  { %v450_v6 = vrot.slane %v1103_v40, 3  ;;  %v267_v7 = vrot.slane %v1103_v40, 2  ;;  %v632_v13 = vrot.slane %v1103_v40, 4  ;;  %v638_v16 = vrot.slane %v1093_v34, 4 }
  0x96   :  { %v1139_v61 = vpop.f32.mrf.mxu0  ;;  %v1149_v3 = vpop.f32.mrf.mxu1 }
  0x97   :  { %v1109_v42 = vpop.f32.mrf.mxu3  ;;  %v1119_v48 = vpop.f32.mrf.mxu2 }
  0x98   :  { %v185_v44 = vrot.slane %v1109_v42, 1  ;;  %v268_v49 = vrot.slane %v1119_v48, 2  ;;  %v274_v54 = vrot.slane %v1109_v42, 2  ;;  %v633_v55 = vrot.slane %v1119_v48, 4 }
  0x99   :  { %646 = vrot.lane.b32.xlu1 %v621_v27, %s967_s25  ;;  %281 = vrot.lane.b32.xlu2 %v256_v28, %s968_s1  ;;  %v179_v56 = vrot.slane %v1119_v48, 1  ;;  %v457_v58 = vrot.slane %v1109_v42, 3  ;;  %v451_v60 = vrot.slane %v1119_v48, 3  ;;  %v639_v17 = vrot.slane %v1109_v42, 4 }
  0x9a   :  { %289 = vrot.lane.b32.xlu0 %v262_v29, %s968_s1  ;;  %v275_v59 = vsel %vm254_vm1, %v273_v57, %v274_v54  ;;  %v186_v4 = vsel %vm165_vm2, %v184_v0, %v185_v44  ;;  %v269_v10 = vsel %vm254_vm1, %v267_v7, %v268_v49  ;;  %v634_v15 = vsel %vm619_vm3, %v632_v13, %v633_v55 }
  0x9b   :  { %v180_v1 = vsel %vm165_vm2, %v178_v62, %v179_v56  ;;  %v458_v2 = vsel %vm437_vm4, %v456_v63, %v457_v58  ;;  %v452_v9 = vsel %vm437_vm4, %v450_v6, %v451_v60  ;;  %v640_v24 = vsel %vm619_vm3, %v638_v16, %v639_v17 }
  0x9e   :  { %v1155_v5 = vpop.f32.mrf.mxu0  ;;  %v1165_v11 = vpop.f32.mrf.mxu1 }
  0x9f   :  { %v170_v8 = vrot.slane %v1155_v5, 1  ;;  %v265_v12 = vrot.slane %v1165_v11, 2  ;;  %v176_v14 = vrot.slane %v1165_v11, 1  ;;  %v442_v18 = vrot.slane %v1155_v5, 3  ;;  %v1187_v29 = vpop.f32.mrf.mxu2 }
  0xa0   :  { %v259_v19 = vrot.slane %v1155_v5, 2  ;;  %v448_v26 = vrot.slane %v1165_v11, 3  ;;  %v624_v27 = vrot.slane %v1155_v5, 4  ;;  %v630_v28 = vrot.slane %v1165_v11, 4 }
  0xa1   :  { %654 = vrot.lane.b32.xlu2 %v627_v31, %s967_s25  ;;  %279 = vrot.lane.b32.xlu1 %v257_v32, %s968_s1  ;;  %v629_v31 = vrot.slane %v1149_v3, 4  ;;  %v169_v32 = vrot.slane %v1139_v61, 1 }
  0xa2   :  { %464 = vrot.lane.b32.xlu0 %v439_v33, %s965_s0  ;;  %v175_v33 = vrot.slane %v1149_v3, 1 }
  0xa3   :  { %v631_v35 = vsel %vm619_vm3, %v629_v31, %v630_v28  ;;  %v171_v36 = vsel %vm165_vm2, %v169_v32, %v170_v8  ;;  %v270_v32 = vrot.slane %v1187_v29, 2 }
  0xa4   :  { %v177_v37 = vsel %vm165_vm2, %v175_v33, %v176_v14  ;;  %v453_v33 = vrot.slane %v1187_v29, 3 }
  0xa9   :  { %198 = vrot.lane.b32.xlu2 %v174_v38, %s966_s24  ;;  %652 = vrot.lane.b32.xlu1 %v628_v39, %s967_s25  ;;  %v1201_v38 = vpop.f32.mrf.mxu2 }
  0xaa   :  { %190 = vrot.lane.b32.xlu0 %v168_v41, %s966_s24  ;;  %v264_v41 = vrot.slane %v1149_v3, 2  ;;  %v182_v43 = vrot.slane %v1201_v38, 1  ;;  %v636_v6 = vrot.slane %v1201_v38, 4 }
  0xac   :  { %v266_v45 = vsel %vm254_vm1, %v264_v41, %v265_v12 }
  0xb1   :  { %287 = vrot.lane.b32.xlu2 %v263_v46, %s968_s1  ;;  %216 = vrot.lane.b32.xlu1 %v185_v44, %s966_s24  ;;  %v258_v44 = vrot.slane %v1139_v61, 2 }
  0xb2   :  { %470 = vrot.lane.b32.xlu0 %v446_v47, %s965_s0  ;;  %v1210_v47 = vpop.f32.mrf.mxu3 }
  0xb3   :  { %v260_v46 = vsel %vm254_vm1, %v258_v44, %v259_v19  ;;  %v187_v16 = vrot.slane %v1210_v47, 1 }
  0xb9   :  { %462 = vrot.lane.b32.xlu2 %v440_v52, %s965_s0  ;;  %297 = vrot.lane.b32.xlu1 %v268_v49, %s968_s1  ;;  %v441_v52 = vrot.slane %v1139_v61, 3 }
  0xba   :  { %644 = vrot.lane.b32.xlu0 %v622_v53, %s967_s25 }
  0xbb   :  { %v443_v57 = vsel %vm437_vm4, %v441_v52, %v442_v18 }
  0xc1   :  { %305 = vrot.lane.b32.xlu2 %v274_v54, %s968_s1  ;;  %662 = vrot.lane.b32.xlu1 %v633_v55, %s967_s25  ;;  %v454_v54 = vrot.slane %v1201_v38, 3  ;;  %v623_v55 = vrot.slane %v1139_v61, 4 }
  0xc2   :  { %208 = vrot.lane.b32.xlu0 %v179_v56, %s966_s24 }
  0xc3   :  { %v455_v41 = vsel %vm437_vm4, %v453_v33, %v454_v54 }
  0xc9   :  { %488 = vrot.lane.b32.xlu2 %v457_v58, %s965_s0  ;;  %303 = vrot.lane.b32.xlu1 %v275_v59, %s968_s1  ;;  %v625_v58 = vsel %vm619_vm3, %v623_v55, %v624_v27  ;;  %v459_v55 = vrot.slane %v1210_v47, 3 }
  0xca   :  { %480 = vrot.lane.b32.xlu0 %v451_v60, %s965_s0 }
  0xd1   :  { %206 = vrot.lane.b32.xlu2 %v180_v1, %s966_s24  ;;  %486 = vrot.lane.b32.xlu1 %v458_v2, %s965_s0  ;;  %v447_v1 = vrot.slane %v1149_v3, 3  ;;  %v1225_v2 = vpop.f32.mrf.mxu3 }
  0xd2   :  { %214 = vrot.lane.b32.xlu0 %v186_v4, %s966_s24 }
  0xd9   :  { %478 = vrot.lane.b32.xlu2 %v452_v9, %s965_s0  ;;  %196 = vrot.lane.b32.xlu1 %v170_v8, %s966_s24 }
  0xda   :  { %295 = vrot.lane.b32.xlu0 %v269_v10, %s968_s1  ;;  %v449_v10 = vsel %vm437_vm4, %v447_v1, %v448_v26 }
  0xe1   :  { %293 = vrot.lane.b32.xlu2 %v265_v12, %s968_s1  ;;  %204 = vrot.lane.b32.xlu1 %v176_v14, %s966_s24 }
  0xe2   :  { %660 = vrot.lane.b32.xlu0 %v634_v15, %s967_s25 }
  0xe9   :  { %468 = vrot.lane.b32.xlu2 %v442_v18, %s965_s0  ;;  %285 = vrot.lane.b32.xlu1 %v259_v19, %s968_s1  ;;  %v181_v18 = vrot.slane %v1187_v29, 1 }
  0xea   :  { %668 = vrot.lane.b32.xlu0 %v640_v24, %s967_s25 }
  0xeb   :  { %v201_v25 = vpop.permute.xlu2 %200 }
  0xec   :  { %v243_v60 = vadd.f32 %v201_v25, %v1075_v23  ;;  %v188_v23 = vrot.slane %v1225_v2, 1 }
  0xee   :  { %v189_v25 = vsel %vm165_vm2, %v187_v16, %v188_v23 }
  0xf1   :  { %476 = vrot.lane.b32.xlu2 %v448_v26, %s965_s0  ;;  %650 = vrot.lane.b32.xlu1 %v624_v27, %s967_s25  ;;  %v271_v26 = vrot.slane %v1201_v38, 2  ;;  %v183_v27 = vsel %vm165_vm2, %v181_v18, %v182_v43  ;;  %vm882_vm2 = vcmask 130048  }
  0xf2   :  { %658 = vrot.lane.b32.xlu0 %v630_v28, %s967_s25 }
  0xf3   :  { %v282_v30 = vpop.permute.xlu2 %281 }
  0xf9   :  { %656 = vrot.lane.b32.xlu2 %v631_v35, %s967_s25  ;;  %194 = vrot.lane.b32.xlu1 %v171_v36, %s966_s24 }
  0xfa   :  { %202 = vrot.lane.b32.xlu0 %v177_v37, %s966_s24  ;;  %v272_v37 = vsel %vm254_vm1, %v270_v32, %v271_v26 }
  0xfb   :  { %v655_v39 = vpop.permute.xlu2 %654 }
 0x101   :  { %212 = vrot.lane.b32.xlu2 %v182_v43, %s966_s24  ;;  %291 = vrot.lane.b32.xlu1 %v266_v45, %s968_s1 }
 0x102   :  { %283 = vrot.lane.b32.xlu0 %v260_v46, %s968_s1 }
 0x103   :  { %v473_v49 = vpop.permute.xlu1 %472  ;;  %v199_v50 = vpop.permute.xlu2 %198 }
 0x104   :  { %v193_v51 = vpop.permute.xlu0 %192  ;;  %v242_v59 = vadd.f32 %v199_v50, %v1071_v21 }
 0x105   :  { %v239_v53 = vadd.f32 %v193_v51, %v1073_v22 }
 0x107   :  { %v328_v56 = vadd.f32 %v282_v30, %v239_v53 }
 0x109   :  { %484 = vrot.lane.b32.xlu2 %v454_v54, %s965_s0  ;;  %466 = vrot.lane.b32.xlu1 %v443_v57, %s965_s0  ;;  %v346_v43 = vsel %vm345_vm6, %v328_v56, -inf }
 0x10a   :  { %648 = vrot.lane.b32.xlu0 %v625_v58, %s967_s25 }
 0x10b   :  { %v647_v22 = vpop.permute.xlu1 %646  ;;  %v288_v62 = vpop.permute.xlu2 %287 }
 0x10c   :  { %v331_v63 = vadd.f32 %v288_v62, %v242_v59  ;;  %v290_v0 = vpop.permute.xlu0 %289 }
 0x10d   :  { %v332_v4 = vadd.f32 %v290_v0, %v243_v60 }
 0x10e   :  { %v363_v7 = vsel %vm343_vm5, %v331_v63, -inf }
 0x10f   :  { %v364_v21 = vsel %vm345_vm6, %v332_v4, -inf  ;;  %v515_v8 = vadd.f32 %v473_v49, %v332_v4 }
 0x110   :  { %v1230_v9 = vmax.f32 %v363_v7, %v364_v21 }
 0x111   :  { %v697_v12 = vadd.f32 %v655_v39, %v515_v8  ;;  %666 = vrot.lane.b32.xlu2 %v636_v6, %s967_s25  ;;  %474 = vrot.lane.b32.xlu1 %v449_v10, %s965_s0  ;;  %v277_v39 = vrot.slane %v1225_v2, 2  ;;  %v547_v60 = vsel %vm528_vm8, %v515_v8, -inf }
 0x112   :  { %220 = vrot.lane.b32.xlu0 %v188_v23, %s966_s24 }
 0x113   :  { %v463_v13 = vpop.permute.xlu2 %462  ;;  %v280_v14 = vpop.permute.xlu1 %279  ;;  %v729_v7 = vsel %vm710_vm10, %v697_v12, -inf }
 0x114   :  { %v465_v15 = vpop.permute.xlu0 %464 }
 0x115   :  { %v511_v19 = vadd.f32 %v465_v15, %v328_v56  ;;  %v635_v56 = vrot.slane %v1187_v29, 4  ;;  %v276_v15 = vrot.slane %v1210_v47, 2 }
 0x117   :  { %v693_v24 = vadd.f32 %v647_v22, %v511_v19  ;;  %v529_v49 = vsel %vm528_vm8, %v511_v19, -inf  ;;  %v637_v4 = vsel %vm619_vm3, %v635_v56, %v636_v6  ;;  %v641_v6 = vrot.slane %v1210_v47, 4 }
 0x119   :  { %218 = vrot.lane.b32.xlu2 %v189_v25, %s966_s24  ;;  %210 = vrot.lane.b32.xlu1 %v183_v27, %s966_s24  ;;  %v711_v16 = vsel %vm710_vm10, %v693_v24, -inf }
 0x11a   :  { %301 = vrot.lane.b32.xlu0 %v271_v26, %s968_s1  ;;  %v278_v26 = vsel %vm254_vm1, %v276_v15, %v277_v39  ;;  %vm828_vm1 = vcmask 1047559  }
 0x11b   :  { %v306_v28 = vpop.permute.xlu2 %305  ;;  %v653_v30 = vpop.permute.xlu1 %652 }
 0x11c   :  { %v191_v31 = vpop.permute.xlu0 %190 }
 0x11d   :  { %v238_v35 = vadd.f32 %v191_v31, %v1069_v20  ;;  %v460_v20 = vrot.slane %v1225_v2, 3  ;;  %v1303_v31 = vld [vmem:[%s1515_s2] ss:$0 sm:$0xff]  ;;  %s971_s2 = smov 88  }
 0x11f   :  { %v327_v36 = vadd.f32 %v280_v14, %v238_v35  ;;  %v461_v1 = vsel %vm437_vm4, %v459_v55, %v460_v20 }
 0x121   :  { %v344_v44 = vsel %vm343_vm5, %v327_v36, -inf  ;;  %299 = vrot.lane.b32.xlu2 %v272_v37, %s968_s1  ;;  %482 = vrot.lane.b32.xlu1 %v455_v41, %s965_s0  ;;  %v510_v45 = vadd.f32 %v463_v13, %v327_v36  ;;  %v642_v13 = vrot.slane %v1225_v2, 4 }
 0x122   :  { %v1257_v46 = vmax.f32 %v344_v44, %v346_v43  ;;  %309 = vrot.lane.b32.xlu0 %v277_v39, %s968_s1 }
 0x123   :  { %v489_v50 = vpop.permute.xlu2 %488  ;;  %v217_v51 = vpop.permute.xlu1 %216  ;;  %v527_v52 = vsel %vm526_vm7, %v510_v45, -inf  ;;  %v643_v25 = vsel %vm619_vm3, %v641_v6, %v642_v13  ;;  %vm884_vm3 = vcmask 195584  }
 0x124   :  { %v251_v53 = vadd.f32 %v217_v51, %v1109_v42  ;;  %v471_v54 = vpop.permute.xlu0 %470  ;;  %v1266_v57 = vmax.f32 %v527_v52, %v529_v49 }
 0x125   :  { %v514_v58 = vadd.f32 %v471_v54, %v331_v63 }
 0x126   :  { %v340_v59 = vadd.f32 %v306_v28, %v251_v53 }
 0x127   :  { %v546_v22 = vsel %vm526_vm7, %v514_v58, -inf  ;;  %v696_v62 = vadd.f32 %v653_v30, %v514_v58 }
 0x128   :  { %v1270_v0 = vmax.f32 %v546_v22, %v547_v60  ;;  %v1280_v21 = vadd.f32 %v489_v50, %v340_v59  ;;  %v400_v44 = vsel %vm345_vm6, %v340_v59, -inf }
 0x129   :  { %v728_v63 = vsel %vm708_vm9, %v696_v62, -inf  ;;  %490 = vrot.lane.b32.xlu2 %v461_v1, %s965_s0  ;;  %664 = vrot.lane.b32.xlu1 %v637_v4, %s967_s25 }
 0x12a   :  { %v1282_v8 = vmax.f32 %v728_v63, %v729_v7  ;;  %492 = vrot.lane.b32.xlu0 %v460_v20, %s965_s0  ;;  %v583_v54 = vsel %vm528_vm8, %v1280_v21, -inf }
 0x12b   :  { %v207_v23 = vpop.permute.xlu2 %206  ;;  %v298_v10 = vpop.permute.xlu1 %297 }
 0x12c   :  { %v645_v14 = vpop.permute.xlu0 %644  ;;  %v246_v50 = vadd.f32 %v207_v23, %v1103_v40 }
 0x12d   :  { %v692_v12 = vadd.f32 %v645_v14, %v510_v45 }
 0x12f   :  { %v709_v18 = vsel %vm708_vm9, %v692_v12, -inf }
 0x130   :  { %v1290_v19 = vmax.f32 %v709_v18, %v711_v16  ;;  %v366_v18 = vrot.slane %v1230_v9, 4 }
 0x131   :  { %672 = vrot.lane.b32.xlu2 %v643_v25, %s967_s25  ;;  %670 = vrot.lane.b32.xlu1 %v639_v17, %s967_s25 }
 0x132   :  { %307 = vrot.lane.b32.xlu0 %v278_v26, %s968_s1 }
 0x133   :  { %v479_v27 = vpop.permute.xlu2 %478  ;;  %v663_v28 = vpop.permute.xlu1 %662 }
 0x134   :  { %v209_v30 = vpop.permute.xlu0 %208 }
 0x135   :  { %v247_v24 = vadd.f32 %v209_v30, %v1119_v48 }
 0x137   :  { %v336_v32 = vadd.f32 %v298_v10, %v247_v24 }
 0x139   :  { %782 = vrot.lane.b32.xlu2 %v1303_v31, %s969_s28  ;;  %600 = vrot.lane.b32.xlu1 %v1303_v31, %s970_s29  ;;  %v382_v58 = vsel %vm345_vm6, %v336_v32, -inf }
 0x13a   :  { %674 = vrot.lane.b32.xlu0 %v642_v13, %s967_s25 }
 0x13b   :  { %v294_v42 = vpop.permute.xlu2 %293  ;;  %v304_v17 = vpop.permute.xlu1 %303 }
 0x13c   :  { %v481_v33 = vpop.permute.xlu0 %480 }
 0x13d   :  { %v519_v35 = vadd.f32 %v481_v33, %v336_v32 }
 0x13f   :  { %v701_v36 = vadd.f32 %v663_v28, %v519_v35  ;;  %v565_v62 = vsel %vm528_vm8, %v519_v35, -inf }
 0x141   :  { %v747_v14 = vsel %vm710_vm10, %v701_v36, -inf }
 0x143   :  { %v487_v48 = vpop.permute.xlu1 %486  ;;  %v1308_v37 = vpop.permute.xlu2 %468 }
 0x144   :  { %v215_v39 = vpop.permute.xlu0 %214 }
 0x145   :  { %v250_v41 = vadd.f32 %v215_v39, %v1093_v34 }
 0x147   :  { %v339_v43 = vadd.f32 %v304_v17, %v250_v41 }
 0x149   :  { %v399_v45 = vsel %vm343_vm5, %v339_v43, -inf  ;;  %v522_v20 = vadd.f32 %v487_v48, %v339_v43 }
 0x14a   :  { %v1313_v49 = vmax.f32 %v399_v45, %v400_v44 }
 0x14b   :  { %v477_v51 = vpop.permute.xlu2 %476  ;;  %v197_v52 = vpop.permute.xlu1 %196  ;;  %v582_v53 = vsel %vm526_vm7, %v522_v20, -inf }
 0x14c   :  { %v296_v55 = vpop.permute.xlu0 %295  ;;  %v1319_v56 = vmax.f32 %v582_v53, %v583_v54 }
 0x14d   :  { %v335_v34 = vadd.f32 %v296_v55, %v246_v50  ;;  %v531_v50 = vrot.slane %v1266_v57, 4 }
 0x14f   :  { %v381_v59 = vsel %vm343_vm5, %v335_v34, -inf  ;;  %v518_v60 = vadd.f32 %v479_v27, %v335_v34  ;;  %v367_v27 = vmax.f32 %v1230_v9, %v366_v18 }
 0x150   :  { %v383_v22 = vmax.f32 %v381_v59, %v382_v58 }
 0x151   :  { %v564_v40 = vsel %vm526_vm7, %v518_v60, -inf  ;;  %v368_v24 = vrot.slane %v367_v27, 2 }
 0x152   :  { %v1325_v1 = vmax.f32 %v564_v40, %v565_v62  ;;  %v384_v36 = vrot.slane %v383_v22, 4 }
 0x153   :  { %v1327_v4 = vpop.permute.xlu2 %656  ;;  %v205_v7 = vpop.permute.xlu1 %204  ;;  %v369_v33 = vmax.f32 %v367_v27, %v368_v24 }
 0x154   :  { %v661_v63 = vpop.permute.xlu0 %660  ;;  %v245_v23 = vadd.f32 %v205_v7, %v1165_v11  ;;  %v385_v44 = vmax.f32 %v383_v22, %v384_v36  ;;  %v731_v7 = vrot.slane %v1282_v8, 4 }
 0x155   :  { %v700_v10 = vadd.f32 %v661_v63, %v518_v60  ;;  %v370_v9 = vrot.slane %v369_v33, 1  ;;  %v549_v60 = vrot.slane %v1270_v0, 4 }
 0x156   :  { %v334_v13 = vadd.f32 %v294_v42, %v245_v23  ;;  %v348_v42 = vrot.slane %v1257_v46, 4  ;;  %v386_v54 = vrot.slane %v385_v44, 2  ;;  %v732_v27 = vmax.f32 %v1282_v8, %v731_v7 }
 0x157   :  { %v746_v6 = vsel %vm708_vm9, %v700_v10, -inf  ;;  %v371_v45 = vmax.f32 %v369_v33, %v370_v9  ;;  %v550_v18 = vmax.f32 %v1270_v0, %v549_v60 }
 0x158   :  { %v1332_v12 = vmax.f32 %v746_v6, %v747_v14  ;;  %v1340_v28 = vadd.f32 %v477_v51, %v334_v13  ;;  %v349_v35 = vmax.f32 %v1257_v46, %v348_v42  ;;  %v241_v51 = vadd.f32 %v197_v52, %v1155_v5 }
 0x159   :  { %v423_v59 = vadd.f32 %v1303_v31, %v371_v45  ;;  %v532_v5 = vmax.f32 %v1266_v57, %v531_v50  ;;  %v713_v52 = vrot.slane %v1290_v19, 4  ;;  %v373_v63 = vsel %vm345_vm6, %v334_v13, -inf }
 0x15a   :  { %v350_v43 = vrot.slane %v349_v35, 2  ;;  %v387_v10 = vmax.f32 %v385_v44, %v386_v54 }
 0x15b   :  { %v1334_v15 = vpop.permute.xlu2 %212  ;;  %v286_v16 = vpop.permute.xlu1 %285  ;;  %v431_v57 = vmax.f32 %v423_v59, 0.0  ;;  %v714_v42 = vmax.f32 %v1290_v19, %v713_v52  ;;  %v733_v19 = vrot.slane %v732_v27, 2 }
 0x15c   :  { %v669_v25 = vpop.permute.xlu0 %668  ;;  %v330_v55 = vadd.f32 %v286_v16, %v241_v51 }
 0x15d   :  { %v1337_v26 = vadd.f32 %v669_v25, %v522_v20  ;;  %v351_v20 = vmax.f32 %v349_v35, %v350_v43  ;;  %v551_v43 = vrot.slane %v550_v18, 2  ;;  %v1380_v51 = vrot.slane %v431_v57, 6 }
 0x15e   :  { %v355_v14 = vsel %vm345_vm6, %v330_v55, -inf  ;;  %v1374_v13 = vadd.f32 %v1308_v37, %v330_v55  ;;  %v749_v37 = vrot.slane %v1332_v12, 4 }
 0x15f   :  { %v352_v40 = vrot.slane %v351_v20, 1 }
 0x161   :  { %v353_v35 = vmax.f32 %v351_v20, %v352_v40 }
 0x163   :  { %v1342_v11 = vpop.permute.xlu2 %484  ;;  %v651_v30 = vpop.permute.xlu1 %650 }
 0x164   :  { %v659_v32 = vpop.permute.xlu0 %658  ;;  %v695_v44 = vadd.f32 %v651_v30, %v1374_v13  ;;  %v1386_v30 = vmax.f32 %v550_v18, %v551_v43 }
 0x165   :  { %v1346_v17 = vadd.f32 %v659_v32, %v1340_v28  ;;  %v533_v32 = vrot.slane %v532_v5, 2 }
 0x167   :  { %v1383_v20 = vmax.f32 %v532_v5, %v533_v32  ;;  %v750_v5 = vmax.f32 %v1332_v12, %v749_v37  ;;  %v553_v12 = vrot.slane %v1386_v30, 1 }
 0x16b   :  { %v1349_v48 = vpop.permute.xlu2 %666  ;;  %v195_v39 = vpop.permute.xlu1 %194 }
 0x16c   :  { %v203_v41 = vpop.permute.xlu0 %202  ;;  %v240_v46 = vadd.f32 %v195_v39, %v1139_v61  ;;  %v402_v61 = vrot.slane %v1313_v49, 4  ;;  %v388_v39 = vrot.slane %v387_v10, 1 }
 0x16d   :  { %v244_v53 = vadd.f32 %v203_v41, %v1149_v3 }
 0x16e   :  { %v403_v36 = vmax.f32 %v1313_v49, %v402_v61  ;;  %v715_v49 = vrot.slane %v714_v42, 2  ;;  %v389_v59 = vmax.f32 %v387_v10, %v388_v39  ;;  %v585_v10 = vrot.slane %v1319_v56, 4 }
 0x16f   :  { %v751_v39 = vrot.slane %v750_v5, 2 }
 0x173   :  { %v1355_v34 = vpop.permute.xlu2 %218  ;;  %v292_v58 = vpop.permute.xlu1 %291 }
 0x174   :  { %v284_v22 = vpop.permute.xlu0 %283  ;;  %v1359_v62 = vadd.f32 %v292_v58, %v244_v53  ;;  %v404_v58 = vrot.slane %v403_v36, 2 }
 0x175   :  { %v329_v3 = vadd.f32 %v284_v22, %v240_v46  ;;  %v421_v46 = vadd.f32 %v1303_v31, %v353_v35  ;;  %v720_v22 = vsel %vm710_vm10, %v695_v44, -inf }
 0x176   :  { %v372_v23 = vsel %vm343_vm5, %v1359_v62, -inf }
 0x177   :  { %v354_v6 = vsel %vm343_vm5, %v329_v3, -inf  ;;  %v374_v16 = vmax.f32 %v372_v23, %v373_v63  ;;  %v535_v63 = vrot.slane %v1383_v20, 1  ;;  %v1394_v23 = vmax.f32 %v714_v42, %v715_v49 }
 0x178   :  { %v356_v25 = vmax.f32 %v354_v6, %v355_v14  ;;  %v1397_v6 = vmax.f32 %v403_v36, %v404_v58 }
 0x179   :  { %v375_v24 = vrot.slane %v374_v16, 4 }
 0x17a   :  { %v357_v33 = vrot.slane %v356_v25, 4 }
 0x17b   :  { %v376_v9 = vmax.f32 %v374_v16, %v375_v24  ;;  %v1377_v41 = vpop.permute.xlu2 %299  ;;  %v467_v0 = vpop.permute.xlu1 %466  ;;  %v425_v16 = vadd.f32 %v1303_v31, %v389_v59  ;;  %v429_v24 = vmax.f32 %v421_v46, 0.0  ;;  %v249_v46 = vadd.f32 %v1334_v15, %v1201_v38 }
 0x17c   :  { %v358_v8 = vmax.f32 %v356_v25, %v357_v33  ;;  %v649_v45 = vpop.permute.xlu0 %648  ;;  %v512_v50 = vadd.f32 %v467_v0, %v329_v3  ;;  %v1390_v3 = vmax.f32 %v732_v27, %v733_v19  ;;  %v717_v0 = vrot.slane %v1394_v23, 1 }
 0x17d   :  { %v377_v53 = vrot.slane %v376_v9, 2  ;;  %v433_v19 = vmax.f32 %v425_v16, 0.0 }
 0x17e   :  { %v359_v54 = vrot.slane %v358_v8, 2  ;;  %v694_v55 = vadd.f32 %v649_v45, %v512_v50  ;;  %v735_v35 = vrot.slane %v1390_v3, 1  ;;  %v406_v45 = vrot.slane %v1397_v6, 1 }
 0x17f   :  { %v378_v60 = vmax.f32 %v376_v9, %v377_v53  ;;  %v537_v58 = vsel %vm526_vm7, %v512_v50, -inf }
 0x180   :  { %v360_v40 = vmax.f32 %v358_v8, %v359_v54  ;;  %v719_v7 = vsel %vm708_vm9, %v694_v55, -inf  ;;  %v1412_v8 = vmax.f32 %v1319_v56, %v585_v10  ;;  %v752_v55 = vmax.f32 %v750_v5, %v751_v39 }
 0x181   :  { %v379_v52 = vrot.slane %v378_v60, 1  ;;  %v721_v61 = vmax.f32 %v719_v7, %v720_v22  ;;  %v818_v22 = vrot.slane %v433_v19, 4 }
 0x182   :  { %v361_v14 = vrot.slane %v360_v40, 1  ;;  %v753_v39 = vrot.slane %v752_v55, 1 }
 0x183   :  { %v380_v18 = vmax.f32 %v378_v60, %v379_v52  ;;  %v722_v25 = vrot.slane %v721_v61, 4  ;;  %v1400_v57 = vpop.permute.xlu2 %490  ;;  %v475_v27 = vpop.permute.xlu1 %474 }
 0x184   :  { %v362_v32 = vmax.f32 %v360_v40, %v361_v14  ;;  %v1403_v33 = vpop.permute.xlu0 %220  ;;  %v516_v42 = vadd.f32 %v475_v27, %v1359_v62  ;;  %v567_v62 = vrot.slane %v1325_v1, 4  ;;  %v538_v40 = vsel %vm528_vm8, %v1374_v13, -inf }
 0x185   :  { %v424_v36 = vadd.f32 %v1303_v31, %v380_v18  ;;  %v723_v9 = vmax.f32 %v721_v61, %v722_v25  ;;  %v539_v14 = vmax.f32 %v537_v58, %v538_v40 }
 0x186   :  { %v422_v43 = vadd.f32 %v1303_v31, %v362_v32  ;;  %v698_v44 = vadd.f32 %v1327_v4, %v516_v42  ;;  %v738_v4 = vsel %vm710_vm10, %v1346_v17, -inf  ;;  %v555_v50 = vsel %vm526_vm7, %v516_v42, -inf }
 0x187   :  { %v724_v37 = vrot.slane %v723_v9, 2  ;;  %v432_v49 = vmax.f32 %v424_v36, 0.0  ;;  %v568_v32 = vmax.f32 %v1325_v1, %v567_v62  ;;  %v556_v42 = vsel %vm528_vm8, %v1340_v28, -inf }
 0x188   :  { %v430_v53 = vmax.f32 %v422_v43, 0.0  ;;  %v737_v54 = vsel %vm708_vm9, %v698_v44, -inf  ;;  %v557_v43 = vmax.f32 %v555_v50, %v556_v42  ;;  %v407_v1 = vmax.f32 %v1397_v6, %v406_v45 }
 0x189   :  { %v725_v59 = vmax.f32 %v723_v9, %v724_v37  ;;  %v739_v60 = vmax.f32 %v737_v54, %v738_v4  ;;  %v815_v15 = vrot.slane %v432_v49, 5  ;;  %v569_v37 = vrot.slane %v568_v32, 2 }
 0x18a   :  { %v809_v56 = vrot.slane %v430_v53, 7  ;;  %v754_v53 = vmax.f32 %v752_v55, %v753_v39  ;;  %v558_v6 = vrot.slane %v557_v43, 4 }
 0x18b   :  { %v1424_v7 = vpop.permute.xlu2 %672  ;;  %v211_v52 = vpop.permute.xlu1 %210  ;;  %v740_v5 = vrot.slane %v739_v60, 4  ;;  %v726_v13 = vrot.slane %v725_v59, 1  ;;  %v570_v42 = vmax.f32 %v568_v32, %v569_v37 }
 0x18c   :  { %v811_v38 = vsel %vm810_vm11, %v809_v56, %v429_v24  ;;  %v302_v17 = vpop.permute.xlu0 %301  ;;  %v248_v61 = vadd.f32 %v211_v52, %v1187_v29  ;;  %v736_v24 = vmax.f32 %v1390_v3, %v735_v35  ;;  %v587_v3 = vrot.slane %v1412_v8, 2 }
 0x18d   :  { %v338_v10 = vadd.f32 %v302_v17, %v249_v46  ;;  %v814_v16 = vsel %vm813_vm12, %v1380_v51, %v811_v38  ;;  %v741_v18 = vmax.f32 %v739_v60, %v740_v5  ;;  %v540_v35 = vrot.slane %v539_v14, 4 }
 0x18e   :  { %v337_v25 = vadd.f32 %v1377_v41, %v248_v61  ;;  %v817_v27 = vsel %vm816_vm13, %v815_v15, %v814_v16  ;;  %v718_v41 = vmax.f32 %v1394_v23, %v717_v0  ;;  %v727_v19 = vmax.f32 %v725_v59, %v726_v13 }
 0x18f   :  { %v1436_v29 = vsel %vm819_vm14, %v818_v22, %v817_v27  ;;  %v742_v36 = vrot.slane %v741_v18, 2  ;;  %v391_v51 = vsel %vm345_vm6, %v338_v10, -inf  ;;  %v521_v28 = vadd.f32 %v1342_v11, %v338_v10 }
 0x190   :  { %v390_v9 = vsel %vm343_vm5, %v337_v25, -inf  ;;  %v541_v55 = vmax.f32 %v539_v14, %v540_v35  ;;  %v559_v16 = vmax.f32 %v557_v43, %v558_v6  ;;  %v253_v6 = vadd.f32 %v1403_v33, %v1225_v2 }
 0x191   :  { %v392_v44 = vmax.f32 %v390_v9, %v391_v51  ;;  %v743_v62 = vmax.f32 %v741_v18, %v742_v36  ;;  %v574_v15 = vsel %vm528_vm8, %v521_v28, -inf  ;;  %v703_v14 = vadd.f32 %v1349_v48, %v521_v28 }
 0x192   :  { %v588_v9 = vmax.f32 %v1412_v8, %v587_v3  ;;  %v536_v8 = vmax.f32 %v1383_v20, %v535_v63 }
 0x193   :  { %v1446_v49 = vpop.permute.xlu2 %782  ;;  %v393_v54 = vrot.slane %v392_v44, 4  ;;  %v483_v46 = vpop.permute.xlu1 %482  ;;  %v744_v4 = vrot.slane %v743_v62, 1 }
 0x194   :  { %v785_v23 = vadd.f32 %v1446_v49, %v718_v41  ;;  %v786_v0 = vadd.f32 %v1446_v49, %v727_v19  ;;  %v787_v56 = vadd.f32 %v1446_v49, %v736_v24  ;;  %v310_v58 = vpop.permute.xlu0 %309  ;;  %v520_v59 = vadd.f32 %v483_v46, %v337_v25 }
 0x195   :  { %v394_v45 = vmax.f32 %v392_v44, %v393_v54  ;;  %v789_v60 = vadd.f32 %v1446_v49, %v754_v53  ;;  %v745_v22 = vmax.f32 %v743_v62, %v744_v4  ;;  %v427_v25 = vadd.f32 %v1303_v31, %v407_v1 }
 0x196   :  { %v794_v11 = vmax.f32 %v786_v0, 0.0  ;;  %v795_v40 = vmax.f32 %v787_v56, 0.0  ;;  %v793_v52 = vmax.f32 %v785_v23, 0.0  ;;  %v573_v5 = vsel %vm526_vm7, %v520_v59, -inf }
 0x197   :  { %v395_v38 = vrot.slane %v394_v45, 2  ;;  %v788_v17 = vadd.f32 %v1446_v49, %v745_v22  ;;  %v575_v10 = vmax.f32 %v573_v5, %v574_v15  ;;  %v797_v18 = vmax.f32 %v789_v60, 0.0 }
 0x198   :  { %v864_v61 = vrot.slane %v794_v11, 7  ;;  %v866_v50 = vrot.slane %v795_v40, 6  ;;  %v542_v44 = vrot.slane %v541_v55, 2  ;;  %v560_v53 = vrot.slane %v559_v16, 2 }
 0x199   :  { %v396_v13 = vmax.f32 %v394_v45, %v395_v38  ;;  %v576_v27 = vrot.slane %v575_v10, 4  ;;  %v796_v24 = vmax.f32 %v788_v17, 0.0  ;;  %v870_v54 = vrot.slane %v797_v18, 4 }
 0x19a   :  { %v865_v39 = vsel %vm810_vm11, %v864_v61, %v793_v52  ;;  %v435_v48 = vmax.f32 %v427_v25, 0.0  ;;  %v756_v46 = vsel %vm710_vm10, %v703_v14, -inf  ;;  %v554_v0 = vmax.f32 %v1386_v30, %v553_v12 }
 0x19b   :  { %v397_v36 = vrot.slane %v396_v13, 1  ;;  %v665_v51 = vpop.permute.xlu1 %664  ;;  %v867_v41 = vsel %vm813_vm12, %v866_v50, %v865_v39  ;;  %v577_v35 = vmax.f32 %v575_v10, %v576_v27  ;;  %v868_v62 = vrot.slane %v796_v24, 5 }
 0x19c   :  { %v493_v43 = vpop.permute.xlu0 %492  ;;  %v702_v19 = vadd.f32 %v665_v51, %v520_v59  ;;  %v543_v56 = vmax.f32 %v541_v55, %v542_v44  ;;  %v589_v45 = vrot.slane %v588_v9, 1  ;;  %v571_v59 = vrot.slane %v570_v42, 1 }
 0x19d   :  { %v398_v1 = vmax.f32 %v396_v13, %v397_v36  ;;  %v578_v28 = vrot.slane %v577_v35, 2  ;;  %v869_v37 = vsel %vm816_vm13, %v868_v62, %v867_v41  ;;  %v561_v60 = vmax.f32 %v559_v16, %v560_v53 }
 0x19e   :  { %v755_v32 = vsel %vm708_vm9, %v702_v19, -inf  ;;  %v1468_v23 = vsel %vm819_vm14, %v870_v54, %v869_v37  ;;  %v342_v20 = vadd.f32 %v310_v58, %v253_v6  ;;  %v824_v40 = vrot.slane %v435_v48, 2 }
 0x19f   :  { %v426_v3 = vadd.f32 %v1303_v31, %v398_v1  ;;  %v757_v4 = vmax.f32 %v755_v32, %v756_v46  ;;  %v579_v63 = vmax.f32 %v577_v35, %v578_v28  ;;  %v252_v52 = vadd.f32 %v1355_v34, %v1210_v47 }
 0x1a0   :  { %v764_v12 = vsel %vm708_vm9, %v1337_v26, -inf  ;;  %v544_v2 = vrot.slane %v543_v56, 1  ;;  %v525_v33 = vadd.f32 %v493_v43, %v342_v20  ;;  %v562_v17 = vrot.slane %v561_v60, 1 }
 0x1a1   :  { %v758_v22 = vrot.slane %v757_v4, 4  ;;  %v434_v11 = vmax.f32 %v426_v3, 0.0  ;;  %v409_v47 = vsel %vm345_vm6, %v342_v20, -inf  ;;  %v580_v34 = vrot.slane %v579_v63, 1 }
 0x1a2   :  { %v572_v25 = vmax.f32 %v570_v42, %v571_v59  ;;  %v592_v14 = vsel %vm528_vm8, %v525_v33, -inf  ;;  %v590_v24 = vmax.f32 %v588_v9, %v589_v45  ;;  %v545_v41 = vmax.f32 %v543_v56, %v544_v2 }
 0x1a3   :  { %v759_v38 = vmax.f32 %v757_v4, %v758_v22  ;;  %v671_v15 = vpop.permute.xlu1 %670  ;;  %v821_v30 = vrot.slane %v434_v11, 3  ;;  %v563_v44 = vmax.f32 %v561_v60, %v562_v17  ;;  %v581_v19 = vmax.f32 %v579_v63, %v580_v34 }
 0x1a4   :  { %v308_v55 = vpop.permute.xlu0 %307  ;;  %v705_v5 = vadd.f32 %v671_v15, %v1280_v21 }
 0x1a5   :  { %v760_v58 = vrot.slane %v759_v38, 2  ;;  %v341_v61 = vadd.f32 %v308_v55, %v252_v52  ;;  %v823_v50 = vsel %vm822_vm15, %v821_v30, %v1436_v29 }
 0x1a6   :  { %v765_v10 = vsel %vm710_vm10, %v705_v5, -inf  ;;  %v1485_v16 = vsel %vm825_vm0, %v824_v40, %v823_v50 }
 0x1a7   :  { %v761_v26 = vmax.f32 %v759_v38, %v760_v58  ;;  %v408_v13 = vsel %vm343_vm5, %v341_v61, -inf  ;;  %v524_v18 = vadd.f32 %v1400_v57, %v341_v61  ;;  %v766_v21 = vmax.f32 %v764_v12, %v765_v10 }
 0x1a8   :  { %v410_v27 = vmax.f32 %v408_v13, %v409_v47 }
 0x1a9   :  { %v762_v29 = vrot.slane %v761_v26, 1  ;;  %v591_v39 = vsel %vm526_vm7, %v524_v18, -inf  ;;  %v706_v36 = vadd.f32 %v1424_v7, %v524_v18  ;;  %v767_v51 = vrot.slane %v766_v21, 4 }
 0x1aa   :  { %v411_v35 = vrot.slane %v410_v27, 4  ;;  %v593_v43 = vmax.f32 %v591_v39, %v592_v14 }
 0x1ab   :  { %v763_v62 = vmax.f32 %v761_v26, %v762_v29  ;;  %v768_v53 = vmax.f32 %v766_v21, %v767_v51  ;;  %v773_v57 = vsel %vm708_vm9, %v706_v36, -inf  ;;  %v601_v42 = vpop.permute.xlu1 %600 }
 0x1ac   :  { %v412_v1 = vmax.f32 %v410_v27, %v411_v35  ;;  %v594_v54 = vrot.slane %v593_v43, 4  ;;  %v675_v48 = vpop.permute.xlu0 %674  ;;  %v603_v9 = vadd.f32 %v601_v42, %v536_v8  ;;  %v604_v28 = vadd.f32 %v601_v42, %v545_v41 }
 0x1ad   :  { %v790_v46 = vadd.f32 %v1446_v49, %v763_v62  ;;  %v769_v32 = vrot.slane %v768_v53, 2  ;;  %v707_v7 = vadd.f32 %v675_v48, %v525_v33  ;;  %v605_v37 = vadd.f32 %v601_v42, %v554_v0 }
 0x1ae   :  { %v413_v3 = vrot.slane %v412_v1, 2  ;;  %v595_v4 = vmax.f32 %v593_v43, %v594_v54  ;;  %v606_v56 = vadd.f32 %v601_v42, %v563_v44  ;;  %v607_v6 = vadd.f32 %v601_v42, %v572_v25 }
 0x1af   :  { %v770_v45 = vmax.f32 %v768_v53, %v769_v32  ;;  %v774_v59 = vsel %vm710_vm10, %v707_v7, -inf  ;;  %v608_v60 = vadd.f32 %v601_v42, %v581_v19  ;;  %v609_v22 = vadd.f32 %v601_v42, %v590_v24 }
 0x1b0   :  { %v414_v11 = vmax.f32 %v412_v1, %v413_v3  ;;  %v596_v20 = vrot.slane %v595_v4, 2  ;;  %v775_v63 = vmax.f32 %v773_v57, %v774_v59  ;;  %v611_v40 = vmax.f32 %v603_v9, 0.0 }
 0x1b1   :  { %v771_v8 = vrot.slane %v770_v45, 1  ;;  %v612_v52 = vmax.f32 %v604_v28, 0.0  ;;  %v613_v38 = vmax.f32 %v605_v37, 0.0  ;;  %v614_v15 = vmax.f32 %v606_v56, 0.0 }
 0x1b2   :  { %v415_v30 = vrot.slane %v414_v11, 1  ;;  %v597_v12 = vmax.f32 %v595_v4, %v596_v20  ;;  %v776_v0 = vrot.slane %v775_v63, 4  ;;  %v615_v2 = vmax.f32 %v607_v6, 0.0 }
 0x1b3   :  { %v772_v33 = vmax.f32 %v770_v45, %v771_v8  ;;  %v616_v55 = vmax.f32 %v608_v60, 0.0  ;;  %v617_v5 = vmax.f32 %v609_v22, 0.0  ;;  %v839_v17 = vrot.slane %v612_v52, 7 }
 0x1b4   :  { %v416_v58 = vmax.f32 %v414_v11, %v415_v30  ;;  %v777_v61 = vmax.f32 %v775_v63, %v776_v0  ;;  %v598_v50 = vrot.slane %v597_v12, 1  ;;  %v841_v47 = vrot.slane %v613_v38, 6 }
 0x1b5   :  { %v840_v34 = vsel %vm810_vm11, %v839_v17, %v611_v40  ;;  %v843_v10 = vrot.slane %v614_v15, 5  ;;  %v845_v26 = vrot.slane %v615_v2, 4  ;;  %v847_v25 = vrot.slane %v616_v55, 3 }
 0x1b6   :  { %v778_v13 = vrot.slane %v777_v61, 2  ;;  %v599_v18 = vmax.f32 %v597_v12, %v598_v50  ;;  %v842_v21 = vsel %vm813_vm12, %v841_v47, %v840_v34  ;;  %v791_v27 = vadd.f32 %v1446_v49, %v772_v33 }
 0x1b7   :  { %v844_v14 = vsel %vm816_vm13, %v843_v10, %v842_v21  ;;  %v798_v24 = vmax.f32 %v790_v46, 0.0  ;;  %v428_v29 = vadd.f32 %v1303_v31, %v416_v58  ;;  %v849_v41 = vrot.slane %v617_v5, 2 }
 0x1b8   :  { %v779_v39 = vmax.f32 %v777_v61, %v778_v13  ;;  %v610_v36 = vadd.f32 %v601_v42, %v599_v18  ;;  %v846_v51 = vsel %vm819_vm14, %v845_v26, %v844_v14  ;;  %v799_v35 = vmax.f32 %v791_v27, 0.0 }
 0x1b9   :  { %v848_v44 = vsel %vm822_vm15, %v847_v25, %v846_v51  ;;  %v872_v43 = vrot.slane %v798_v24, 3  ;;  %v436_v19 = vmax.f32 %v428_v29, 0.0 }
 0x1ba   :  { %v780_v62 = vrot.slane %v779_v39, 1  ;;  %v618_v53 = vmax.f32 %v610_v36, 0.0  ;;  %v850_v57 = vsel %vm825_vm0, %v849_v41, %v848_v44  ;;  %v874_v1 = vrot.slane %v799_v35, 2 }
 0x1bb   :  { %v827_v54 = vrot.slane %v436_v19, 1  ;;  %v873_v31 = vsel %vm822_vm15, %v872_v43, %v1468_v23 }
 0x1bc   :  { %v851_v48 = vrot.slane %v618_v53, 1  ;;  %v781_v9 = vmax.f32 %v779_v39, %v780_v62  ;;  %v875_v42 = vsel %vm825_vm0, %v874_v1, %v873_v31 }
 0x1bd   :  { %v829_v28 = vsel %vm828_vm1, %v827_v54, %v1485_v16 }
 0x1be   :  { %v852_v46 = vsel %vm828_vm1, %v851_v48, %v850_v57  ;;  %v792_v32 = vadd.f32 %v1446_v49, %v781_v9 }
 0x1bf   :  { %853 = vrot.lane.b32.xlu0 %v852_v46, %s968_s1 }
 0x1c0   :  { %v800_v7 = vmax.f32 %v792_v32, 0.0 }
 0x1c2   :  { %v876_v37 = vrot.slane %v800_v7, 1 }
 0x1c4   :  { %v877_v3 = vsel %vm828_vm1, %v876_v37, %v875_v42 }
 0x1c5   :  { %878 = vrot.lane.b32.xlu1 %v877_v3, %s971_s2 }
 0x231   :  { %v854_v4 = vpop.permute.xlu0 %853 }
 0x232   :  { %v881_v23 = vsel %vm343_vm5, %v829_v28, %v854_v4 }
 0x237   :  { %v879_v16 = vpop.permute.xlu1 %878 }
 0x238   :  { %v883_v49 = vsel %vm882_vm2, %v881_v23, %v879_v16 }
 0x239   :  { %885 = vst.msk [vmem:[#allocation2] sm:$0xff] %vm884_vm3, %v883_v49 }
 0x23a   :  { %896 = dma.vmem_to_hbm [thread:$0]  %s892_s4, 128, %s894_s7, [#allocation3]  }
 0x23b   :  { %963 = dma.done.wait [#allocation3], 128  }
 0x23c   :  { %964 = vsyncadd [#allocation3], 4294967168 }
 0x23d   :  { %901 = vsyncpa [#allocation3], 1 }

</bundles_post_ra>
